<compile_context>
chip_gen: v7x
topology: tpu7x:2x2x1
jax: 0.10.0
libtpu: 0.0.40
codegen_flags: <defaults>
</compile_context>

<pallas_src>
import functools
import math

import jax
import jax.numpy as jnp
from jax.experimental import pallas as pl
from jax.experimental.pallas import tpu as pltpu


# ----------------------------------------------------------------------------
# pe table construction (deterministic buffer, plain JAX glue -- built once)
# ----------------------------------------------------------------------------
def make_pe_table(d_model: int, max_len: int) -> jnp.ndarray:
    position = jnp.arange(max_len, dtype=jnp.float32)[:, None]                 # (L, 1)
    div_term = jnp.exp(
        jnp.arange(0, d_model, 2, dtype=jnp.float32) * (-math.log(10000.0) / d_model)
    )                                                                          # (ceil(D/2),)
    args = position * div_term                                                 # (L, ceil(D/2))
    pe = jnp.zeros((max_len, d_model), dtype=jnp.float32)
    pe = pe.at[:, 0::2].set(jnp.sin(args))
    pe = pe.at[:, 1::2].set(jnp.cos(args[:, : d_model // 2]))                  # safe for odd D
    return pe                                                                  # (L, D)


# ----------------------------------------------------------------------------
# Pallas kernels (all operate on the flattened (block_s, B*D) view)
# ----------------------------------------------------------------------------
def _add_pe(x, pe, batch):
    """x: (bs, B*D); pe: (bs, D), already in x.dtype. Returns x + tile(pe, B)."""
    if batch > 1:
        pe = jnp.concatenate([pe] * batch, axis=-1)   # lane-direction replication
    return x + pe


def pe_add_kernel(x_ref, pe_ref, o_ref, *, batch):
    o_ref[...] = _add_pe(x_ref[...], pe_ref[...], batch).astype(o_ref.dtype)


def pe_add_mask_kernel(x_ref, pe_ref, mask_ref, o_ref, *, batch, scale):
    # Portable training path: int8 keep-mask built outside; scale applied in-kernel.
    y = _add_pe(x_ref[...], pe_ref[...], batch)
    o_ref[...] = jnp.where(mask_ref[...] != 0, y * scale, 0.0).astype(o_ref.dtype)


def pe_add_prng_dropout_kernel(seed_ref, x_ref, pe_ref, o_ref, *, batch, p):
    # Training path using the on-chip TPU PRNG; seed is mixed with the grid index
    # via a multi-word prng_seed so every sequence tile (and every call with a
    # different seed) draws an independent dropout stream.
    pltpu.prng_seed(seed_ref[0], pl.program_id(0))
    y = _add_pe(x_ref[...], pe_ref[...], batch)
    bits = pltpu.prng_random_bits(y.shape)
    if bits.dtype != jnp.uint32:
        bits = pltpu.bitcast(bits, jnp.uint32)
    threshold = jnp.uint32(min(int(round(p * float(2**32))), 2**32 - 1))
    scale = 1.0 / (1.0 - p)
    o_ref[...] = jnp.where(bits >= threshold, y * scale, 0.0).astype(o_ref.dtype)


# ----------------------------------------------------------------------------
# Budget-derived tiling
# ----------------------------------------------------------------------------
def _vmem_limit_bytes() -> int:
    cap = 128 * 1024 * 1024
    try:
        cap = int(pltpu.get_tpu_info().vmem_capacity_bytes)
    except Exception:
        pass  # off-TPU / API unavailable: assume v5e/v6e capacity
    # -> 64 MiB on v5e/v6e (128 MiB physical), 48 MiB on v7x (64 MiB per-TC).
    return min((cap * 3) // 4, 64 * 1024 * 1024)


def _pick_block_s(S: int, row_bytes: int, target_bytes: int) -> int:
    """Sequence rows per tile: multiple of 8, sized to ~target_bytes, >= 2 tiles."""
    if S <= 8:
        return S
    bs = max(8, (target_bytes // max(1, row_bytes)) // 8 * 8)
    two_tile_cap = max(8, (pl.cdiv(S, 2) // 8) * 8)   # keep both v7x cores busy
    return min(bs, two_tile_cap, max(8, (S // 8) * 8))


# ----------------------------------------------------------------------------
# Wrapper (the "module")
# ----------------------------------------------------------------------------
def positional_encoding_forward(
    x: jnp.ndarray,
    pe: jnp.ndarray,
    *,
    dropout_p: float = 0.2,
    training: bool = False,
    rng_key=None,
    seed: int = 0,
    block_s: int | None = None,
    use_tpu_prng: bool | None = None,
    donate_x: bool = False,
) -> jnp.ndarray:
    """x: (S, B, D); pe: (max_len, D).  Returns dropout(x + pe[:S]) like the module."""
    S, B, D = x.shape
    BD = B * D
    pe_slice = pe[:S, :].astype(x.dtype)          # pre-cast: no per-element cast in-kernel
    x2 = x.reshape(S, BD)                         # free, row-major contiguous in HBM

    is_eval = (not training) or dropout_p <= 0.0
    if (not is_eval) and dropout_p >= 1.0:
        return jnp.zeros_like(x)

    if use_tpu_prng is None:
        use_tpu_prng = jax.devices()[0].platform == "tpu"

    n_streams = 2 if (is_eval or use_tpu_prng) else 3   # x, out (+ int8 mask)
    vmem_limit = _vmem_limit_bytes()
    if block_s is None:
        target = (vmem_limit * 85 // 100) // (2 * n_streams)
        block_s = _pick_block_s(S, BD * x.dtype.itemsize, target)
    block_s = min(block_s, S)
    grid = (pl.cdiv(S, block_s),)                 # ragged last tile is clipped by Pallas

    x_spec = pl.BlockSpec((block_s, BD), lambda i: (i, 0))
    pe_spec = pl.BlockSpec((block_s, D), lambda i: (i, 0))
    out_spec = pl.BlockSpec((block_s, BD), lambda i: (i, 0))
    out_shape = jax.ShapeDtypeStruct((S, BD), x.dtype)

    cparams = pltpu.CompilerParams(
        dimension_semantics=("parallel",),        # megacore sharding over seq tiles
        vmem_limit_bytes=vmem_limit,
    )

    if is_eval:
        out2 = pl.pallas_call(
            functools.partial(pe_add_kernel, batch=B),
            out_shape=out_shape,
            grid=grid,
            in_specs=[x_spec, pe_spec],
            out_specs=out_spec,
            compiler_params=cparams,
            input_output_aliases=({0: 0} if donate_x else {}),
        )(x2, pe_slice)
        return out2.reshape(S, B, D)

    if use_tpu_prng:
        # TODO(synk): bit-exact reproduction of torch.nn.Dropout's RNG stream is not
        # possible; the hardware PRNG stream is deterministic given (seed, tile).
        if rng_key is not None:
            seed_arr = jax.random.randint(
                rng_key, (1,), 0, jnp.iinfo(jnp.int32).max, dtype=jnp.int32
            )
        else:
            seed_arr = jnp.asarray([seed], dtype=jnp.int32)
        out2 = pl.pallas_call(
            functools.partial(pe_add_prng_dropout_kernel, batch=B, p=float(dropout_p)),
            out_shape=out_shape,
            grid=grid,
            in_specs=[
                pl.BlockSpec(memory_space=pltpu.MemorySpace.SMEM),
                x_spec,
                pe_spec,
            ],
            out_specs=out_spec,
            compiler_params=cparams,
            input_output_aliases=({1: 0} if donate_x else {}),
        )(seed_arr, x2, pe_slice)
        return out2.reshape(S, B, D)

    # Portable fallback (interpret / non-TPU): int8 keep-mask built in plain JAX
    # (4x less mask HBM traffic than a prescaled f32 mask); add + masked scale
    # stay inside the kernel.
    if rng_key is None:
        rng_key = jax.random.PRNGKey(seed)
    keep = jax.random.bernoulli(rng_key, 1.0 - dropout_p, shape=(S, BD)).astype(jnp.int8)
    mask_spec = pl.BlockSpec((block_s, BD), lambda i: (i, 0))
    out2 = pl.pallas_call(
        functools.partial(
            pe_add_mask_kernel, batch=B, scale=1.0 / (1.0 - float(dropout_p))
        ),
        out_shape=out_shape,
        grid=grid,
        in_specs=[x_spec, pe_spec, mask_spec],
        out_specs=out_spec,
        compiler_params=cparams,
        input_output_aliases=({0: 0} if donate_x else {}),
    )(x2, pe_slice, keep)
    return out2.reshape(S, B, D)


# ----------------------------------------------------------------------------
# Demo / self-check
# ----------------------------------------------------------------------------
if __name__ == "__main__":
    d_model, max_len, seq_len, batch, p = 128, 128, 64, 8, 0.2
    scale = 1.0 / (1.0 - p)

    key = jax.random.PRNGKey(0)
    kx, kd = jax.random.split(key)
    x = jax.random.normal(kx, (seq_len, batch, d_model), dtype=jnp.float32)
    pe = make_pe_table(d_model, max_len)
    ref = x + pe[:seq_len][:, None, :]

    # 1) eval mode (dropout = identity): must match reference
    out_eval = jax.block_until_ready(
        positional_encoding_forward(x, pe, dropout_p=p, training=False)
    )
    assert out_eval.shape == (seq_len, batch, d_model)
    assert jnp.allclose(out_eval, ref, atol=1e-6), "eval-mode mismatch"

    # 1b) eval mode with a ragged ceil-div grid (block_s does not divide S)
    out_rag = jax.block_until_ready(
        positional_encoding_forward(x, pe, dropout_p=p, training=False, block_s=48)
    )
    assert jnp.allclose(out_rag, ref, atol=1e-6), "ragged-grid mismatch"

    # 2) training mode with the on-chip TPU PRNG (default on TPU backends)
    out_train = jax.block_until_ready(
        positional_encoding_forward(x, pe, dropout_p=p, training=True, rng_key=kd)
    )
    ok = jnp.isclose(out_train, 0.0, atol=1e-6) | jnp.isclose(
        out_train, ref * scale, rtol=1e-5, atol=1e-5
    )
    assert bool(jnp.all(ok)), "training-mode values are neither 0 nor scaled ref"
    keep_frac = float(jnp.mean((out_train != 0).astype(jnp.float32)))
    assert abs(keep_frac - (1.0 - p)) < 0.05, f"dropout keep rate off: {keep_frac}"

    # 3) training mode, portable int8-mask fallback path
    out_mask = jax.block_until_ready(
        positional_encoding_forward(
            x, pe, dropout_p=p, training=True, rng_key=kd, use_tpu_prng=False
        )
    )
    okm = jnp.isclose(out_mask, 0.0, atol=1e-6) | jnp.isclose(
        out_mask, ref * scale, rtol=1e-5, atol=1e-5
    )
    assert bool(jnp.all(okm)), "mask-path values are neither 0 nor scaled ref"

    # 4) small / unaligned shapes (single full-extent block, lane dim < 128)
    d_small, s_small, b_small = 32, 8, 2
    pe_small = make_pe_table(d_small, 16)
    x_small = jax.random.normal(
        jax.random.PRNGKey(1), (s_small, b_small, d_small), dtype=jnp.float32
    )
    out_small = jax.block_until_ready(
        positional_encoding_forward(x_small, pe_small, training=False)
    )
    assert jnp.allclose(
        out_small, x_small + pe_small[:s_small][:, None, :], atol=1e-6
    ), "small-shape mismatch"

    print("KERNEL_OK")
</pallas_src>

<mosaic_0001>
module attributes {stable_mosaic.version = 11 : i64} {
  func.func @pe_add_kernel(%arg0: i32, %arg1: memref<32x1024xf32, #tpu.memory_space<vmem>>, %arg2: memref<32x128xf32, #tpu.memory_space<vmem>>, %arg3: memref<32x1024xf32, #tpu.memory_space<vmem>>) attributes {dimension_semantics = [#tpu.dimension_semantics<parallel>], iteration_bounds = array<i64: 2>, scalar_prefetch = 0 : i64, scratch_operands = 0 : i64, tpu.core_type = #tpu.core_type<tc>, window_params = [{transform_indices = @transform_0, window_bounds = array<i64: 32, 1024>}, {transform_indices = @transform_1, window_bounds = array<i64: 32, 128>}, {transform_indices = @transform_2, window_bounds = array<i64: 32, 1024>}]} {
    %c0 = arith.constant 0 : index
    %c0_0 = arith.constant 0 : index
    %0 = vector.load %arg1[%c0, %c0_0] : memref<32x1024xf32, #tpu.memory_space<vmem>>, vector<32x1024xf32>
    %c0_1 = arith.constant 0 : index
    %c0_2 = arith.constant 0 : index
    %1 = vector.load %arg2[%c0_1, %c0_2] : memref<32x128xf32, #tpu.memory_space<vmem>>, vector<32x128xf32>
    %2 = tpu.concatenate %1, %1, %1, %1, %1, %1, %1, %1 in 1 : vector<32x128xf32>, vector<32x128xf32>, vector<32x128xf32>, vector<32x128xf32>, vector<32x128xf32>, vector<32x128xf32>, vector<32x128xf32>, vector<32x128xf32> -> vector<32x1024xf32>
    %3 = arith.addf %0, %2 : vector<32x1024xf32>
    %c0_3 = arith.constant 0 : index
    %c0_4 = arith.constant 0 : index
    %4 = vector.load %arg3[%c0_3, %c0_4] : memref<32x1024xf32, #tpu.memory_space<vmem>>, vector<32x1024xf32>
    tpu.vector_store %arg3[%c0_3, %c0_4], %3 {strides = array<i32>} : memref<32x1024xf32, #tpu.memory_space<vmem>>, vector<32x1024xf32>,
    return
  }
  func.func @transform_0(%arg0: i32) -> (i32, i32) {
    %c0_i32 = arith.constant 0 : i32
    %c0_i32_0 = arith.constant 0 : i32
    return %arg0, %c0_i32 : i32, i32
  }
  func.func @transform_1(%arg0: i32) -> (i32, i32) {
    %c0_i32 = arith.constant 0 : i32
    %c0_i32_0 = arith.constant 0 : i32
    return %arg0, %c0_i32 : i32, i32
  }
  func.func @transform_2(%arg0: i32) -> (i32, i32) {
    %c0_i32 = arith.constant 0 : i32
    %c0_i32_0 = arith.constant 0 : i32
    return %arg0, %c0_i32 : i32, i32
  }
}

</mosaic_0001>

<bundles_post_ra>
// kernel: tpu_custom_call.1
= control target key start
LH: loop header
LB: loop body
LE: loop exit
PB: predicated region body
PF: predicated region fallthrough
CT: control target
= control target key end

     0   :  { %7 = vsyncpa [#allocation3], 0  ;;  %s942_s0 = inlined_call_operand.hbm [shape: f32[64,1024], index: 0, kind: input, shape index: {}]   ;;  %s943_s1 = inlined_call_operand.hbm [shape: f32[64,128], index: 1, kind: input, shape index: {}]   ;;  %s944_s2 = inlined_call_operand.hbm [shape: f32[64,1024], index: 2, kind: output, shape index: {}]  }
   0x1   :  { %9 = vsyncpa [#allocation3 + $0x1], 0 }
   0x2   :  { %10 = vsyncpa [#allocation6], 0 }
   0x3   :  { %12 = vsyncpa [#allocation6 + $0x1], 0 }
   0x4   :  { %13 = vsyncpa [#allocation4], 0 }
   0x5   :  { %15 = vsyncpa [#allocation4 + $0x1], 0  ;;  %s655_s9 = smov 0   ;;  %s657_s10 = smov 0  }
   0x6   :  { %s659_s11 = smov 0   ;;  %s661_s12 = smov 0  }
   0x7 LB: > { %s676_s13 = sadd.s32 4294967295, %s629_s12   ;;  %s417_s14 = sadd.s32 4294967294, %s629_s12   ;;  %s629_s12 = sphi %s661_s12, %s960_s12   ;;  %s625_s11 = sphi %s659_s11, %s959_s11   ;;  %s621_s10 = sphi %s657_s10, %s958_s10   ;;  %s617_s9 = sphi %s655_s9, %s957_s9  }
   0x8   : > { %s680_s15 = sadd.s32 1, %s629_s12   ;;  %s28_s16 = sadd.s32 1, %s625_s11 }
   0x9   : > { %s25_s17 = ssub.s32 %s629_s12, %s680_s15  ;;  %p35_p0 = scmp.ne.s32.totalorder %s625_s11, %s621_s10 }
   0xa   : > { %p26_p1 = scmp.eq.s32.totalorder %s25_s17, 0  ;;  %p36_p2 = scmp.eq.s32.totalorder %s629_s12, 0 }
   0xb   : > { %p41_p3 = scmp.ne.s32.totalorder %s621_s10, %s617_s9  ;;  %p42_p4 = scmp.eq.s32.totalorder %s676_s13, 0 }
   0xc   : > { %s692_s18 = scalar_select %p26_p1, %s625_s11, %s28_s16  }
   0xd   : > { %p694_p5 = por %p36_p2, %p35_p0  ;;  %p698_p6 = por %p42_p4, %p41_p3 }
   0xe   : > { %p91_p7 = scmp.eq.s32.totalorder %s676_s13, 1  ;;  %p97_p8 = scmp.eq.s32.totalorder %s417_s14, 1 }
   0xf   : > { %s948_s20 = scalar_select %p698_p6, 1, 0 }
  0x10   : > { %p459_p10 = scmp.lt.s32.totalorder %s629_s12, 2  ;;  %p705_p11 = por %p91_p7, %p35_p0 }
  0x11   : > { %p709_p12 = por %p97_p8, %p41_p3  ;;  %s714_s23 = sand.u32 1, %s625_s11  }
  0x12   : > { %s949_s21 = scalar_select %p705_p11, 1, 0 }
  0x13   : > { %s950_s22 = scalar_select %p709_p12, 1, 0 }
  0x14   : > { %s438_s24 = sshll.u32 %s629_s12, 12  ;;  %s420_s25 = sshll.u32 %s714_s23, 8 }
  0x15   : > { %s721_s28 = scalar_lea.hbm %s942_s0, %s438_s24  ;;  %s121_s29 = scalar_lea.vmem [#allocation2], %s420_s25 }
  0x16   : > { %s129_s30 = sshll.u32 %s121_s29, 4  ;;  %p725_p13 = pnand %p459_p10, %p694_p5  ;;  %s729_s30 = int_to_ptr.vmem [resolvable:$true] %s129_s30 }
  0x17   : > { %s118_s4 = scalar_lea.sflag [#allocation3], %s714_s23  ;;  %s499_s5 = scalar_lea.hbm %s721_s28, 4096 }
  0x18   : > { %p500_p0 = scmp.ne.s32.totalorder %s721_s28, %s499_s5  ;;  %p501_p1 = pneg %p725_p13 }
  0x19   : > { %s504_s8 = scalar_lea.hbm %s942_s0, 8192  ;;  %p505_p4 = scmp.lt.u32.totalorder %s721_s28, %s942_s0 }
  0x1a   : > { %p502_p2 = pnand %p501_p1, %p500_p0  ;;  %p506_p5 = scmp.lt.u32.totalorder %s504_s8, %s499_s5 }
  0x1b   : > { %p508_p8 = scmp.lt.u32.totalorder %s499_s5, %s721_s28 }
  0x1c   : > { %p503_p3 = pneg %p502_p2  ;;  %p507_p7 = por %p506_p5, %p505_p4 }
  0x1e   : > { %p509_p10 = por %p508_p8, %p507_p7 }
  0x20   : > { %p510_p9 = pnand %p509_p10, %p503_p3 }
  0x22   : > { %513 = shalt.err (!%p510_p9)
}
  0x23   : > { %s514_s17 = scalar_lea.vmem %s729_s30, 4096  ;;  %s631_s19 = smov [#allocation2]  }
  0x24   : > { %p515_p0 = scmp.ne.s32.totalorder %s729_s30, %s514_s17  ;;  %s519_s24 = sshll.u32 %s631_s19, 4  ;;  %s520_s24 = int_to_ptr.vmem [resolvable:$false] %s519_s24 }
  0x25   : > { %s521_s25 = scalar_lea.vmem %s520_s24, 8192  ;;  %p522_p11 = scmp.lt.s32.totalorder %s729_s30, %s520_s24 }
  0x26   : > { %p517_p2 = pnand %p515_p0, %p501_p1  ;;  %p523_p4 = scmp.lt.s32.totalorder %s521_s25, %s514_s17 }
  0x28   : > { %p518_p12 = pneg %p517_p2  ;;  %p524_p5 = por %p523_p4, %p522_p11 }
  0x2a   : > { %p525_p7 = pnand %p524_p5, %p518_p12 }
  0x2c   : > { %528 = shalt.err (!%p525_p7)
}
  0x2d   : > { %s632_s26 = smov 1024   ;;  %s633_s27 = smov 64  }
  0x2e   : > { %451 = dma.hbm_to_vmem [thread:$0]  (!%p725_p13), %s721_s28, 4096, %s729_s30, %s118_s4, %s632_s26, %s632_s26, %s633_s27  }
  0x2f   : > { %p427_p9 = scmp.ge.s32.totalorder %s629_s12, 1  ;;  %p158_p3 = scmp.lt.s32.totalorder %s629_s12, 3 }
  0x30   : > { %s424_s29 = sshll.u32 %s714_s23, 5  ;;  %s439_s6 = sshll.u32 %s629_s12, 9 }
  0x31   : > { %p762_p11 = pnand %p427_p9, %p158_p3  ;;  %s143_s7 = scalar_lea.vmem [#allocation5], %s424_s29 }
  0x32   : > { %s150_s8 = sshll.u32 %s143_s7, 4  ;;  %s770_s17 = scalar_lea.hbm %s943_s1, %s439_s6  ;;  %s772_s8 = int_to_ptr.vmem [resolvable:$true] %s150_s8 }
  0x33   : > { %s140_s28 = scalar_lea.sflag [#allocation6], %s714_s23  ;;  %s529_s30 = scalar_lea.hbm %s770_s17, 512 }
  0x34   : > { %p530_p12 = scmp.ne.s32.totalorder %s770_s17, %s529_s30  ;;  %s534_s24 = scalar_lea.hbm %s943_s1, 1024 }
  0x35   : > { %p535_p0 = scmp.lt.u32.totalorder %s770_s17, %s943_s1  ;;  %p536_p2 = scmp.lt.u32.totalorder %s534_s24, %s529_s30 }
  0x36   : > { %p532_p8 = pnand %p530_p12, %p501_p1  ;;  %p538_p5 = scmp.lt.u32.totalorder %s529_s30, %s770_s17 }
  0x37   : > { %p537_p4 = por %p536_p2, %p535_p0 }
  0x38   : > { %p533_p10 = pneg %p532_p8 }
  0x39   : > { %p539_p7 = por %p538_p5, %p537_p4 }
  0x3b   : > { %p540_p9 = pnand %p539_p7, %p533_p10 }
  0x3d   : > { %543 = shalt.err (!%p540_p9)
}
  0x3e   : > { %s544_s27 = scalar_lea.vmem %s772_s8, 512  ;;  %s634_s29 = smov [#allocation5]  }
  0x3f   : > { %p545_p3 = scmp.ne.s32.totalorder %s772_s8, %s544_s27  ;;  %s549_s6 = sshll.u32 %s634_s29, 4  ;;  %s550_s6 = int_to_ptr.vmem [resolvable:$false] %s549_s6 }
  0x40   : > { %s551_s7 = scalar_lea.vmem %s550_s6, 1024  ;;  %p552_p6 = scmp.lt.s32.totalorder %s772_s8, %s550_s6 }
  0x41   : > { %p547_p12 = pnand %p545_p3, %p501_p1  ;;  %p553_p0 = scmp.lt.s32.totalorder %s551_s7, %s544_s27 }
  0x43   : > { %p548_p8 = pneg %p547_p12  ;;  %p554_p2 = por %p553_p0, %p552_p6 }
  0x45   : > { %p555_p4 = pnand %p554_p2, %p548_p8 }
  0x47   : > { %558 = shalt.err (!%p555_p4)
}
  0x48   : > { %s635_s14 = smov 128   ;;  %s636_s16 = smov 8  }
  0x49   : > { %454 = dma.hbm_to_vmem [thread:$0]  (!%p725_p13), %s770_s17, 512, %s772_s8, %s140_s28, %s635_s14, %s635_s14, %s636_s16  }
  0x4a   : > { %162 = sbr.rel (%p762_p11) target bundleno = 119 (0x77), region = 28  ;;  %s803_s30 = sand.u32 (!%p762_p11), 1, %s621_s10  }
  0x4b   : > { %s428_s4 = sshll.u32 (!%p762_p11), %s803_s30, 8  ;;  %s165_s19 = scalar_lea.sflag (!%p762_p11), [#allocation3], %s803_s30 }
  0x4c   : > { %s807_s24 = scalar_lea.vmem (!%p762_p11), [#allocation2], %s428_s4  ;;  %p953_p6 = scmp.ne.s32.totalorder (!%p762_p11), %s948_s20, 0 }
  0x51   : > { %604 = dma.done.wait (%p953_p6), %s165_s19, 4096  }
  0x52   : > { %606 = vsyncadd (%p953_p6), %s165_s19, 4294963200  ;;  %s429_s23 = sshll.u32 %s803_s30, 5  ;;  %s174_s3 = scalar_lea.sflag [#allocation6], %s803_s30 }
  0x53   : > { %s815_s5 = scalar_lea.vmem [#allocation5], %s429_s23 }
  0x54   : > { %608 = dma.done.wait (%p953_p6), %s174_s3, 512  }
  0x55   : > { %610 = vsyncadd (%p953_p6), %s174_s3, 4294966784  ;;  %v206_v0 = vld [vmem:[%s807_s24] sm:$0xff]  ;;  %v207_v2 = vld [vmem:[%s807_s24 + $0x8] sm:$0xff]  ;;  %s830_s20 = scalar_lea.vmem [#allocation7], %s428_s4  ;;  %s441_s8 = sshll.u32 %s676_s13, 12 }
  0x56   : > { %v238_v1 = vld [vmem:[%s815_s5] sm:$0xff]  ;;  %v208_v5 = vld [vmem:[%s807_s24 + $0x10] sm:$0xff]  ;;  %v209_v6 = vld [vmem:[%s807_s24 + $0x18] sm:$0xff]  ;;  %s321_s17 = sshll.u32 %s830_s20, 4  ;;  %s888_s25 = scalar_lea.hbm %s944_s2, %s441_s8  ;;  %s890_s17 = int_to_ptr.vmem [resolvable:$true] %s321_s17 }
  0x57   : > { %v242_v3 = vadd.f32 %v238_v1, %v206_v0  ;;  %v243_v4 = vadd.f32 %v238_v1, %v207_v2  ;;  %v210_v7 = vld [vmem:[%s807_s24 + $0x20] sm:$0xff]  ;;  %v244_v8 = vadd.f32 %v238_v1, %v208_v5  ;;  %v245_v9 = vadd.f32 %v238_v1, %v209_v6  ;;  %v211_v11 = vld [vmem:[%s807_s24 + $0x28] sm:$0xff]  ;;  %v212_v12 = vld [vmem:[%s807_s24 + $0x30] sm:$0xff]  ;;  %s307_s26 = scalar_lea.sflag [#allocation4], %s803_s30  ;;  %s559_s27 = scalar_lea.vmem %s890_s17, 4096 }
  0x58   : > { %v246_v10 = vadd.f32 %v238_v1, %v210_v7  ;;  %v213_v13 = vld [vmem:[%s807_s24 + $0x38] sm:$0xff]  ;;  %v247_v14 = vadd.f32 %v238_v1, %v211_v11  ;;  %v248_v15 = vadd.f32 %v238_v1, %v212_v12  ;;  %v214_v17 = vld [vmem:[%s807_s24 + $0x40] sm:$0xff]  ;;  %v239_v18 = vld [vmem:[%s815_s5 + $0x8] sm:$0xff]  ;;  %p560_p13 = scmp.ne.s32.totalorder %s890_s17, %s559_s27  ;;  %p954_p1 = scmp.ne.s32.totalorder %s949_s21, 0 }
  0x59   : > { %274 = vst [vmem:[%s830_s20] sm:$0xff] %v242_v3  ;;  %275 = vst [vmem:[%s830_s20 + $0x8] sm:$0xff] %v243_v4  ;;  %v249_v16 = vadd.f32 %v238_v1, %v213_v13  ;;  %v215_v19 = vld [vmem:[%s807_s24 + $0x48] sm:$0xff]  ;;  %v250_v20 = vadd.f32 %v239_v18, %v214_v17  ;;  %v216_v22 = vld [vmem:[%s807_s24 + $0x50] sm:$0xff]  ;;  %s637_s29 = smov [#allocation7]  }
  0x5a   : > { %276 = vst [vmem:[%s830_s20 + $0x10] sm:$0xff] %v244_v8  ;;  %277 = vst [vmem:[%s830_s20 + $0x18] sm:$0xff] %v245_v9  ;;  %v251_v21 = vadd.f32 %v239_v18, %v215_v19  ;;  %v217_v23 = vld [vmem:[%s807_s24 + $0x58] sm:$0xff]  ;;  %v218_v24 = vld [vmem:[%s807_s24 + $0x60] sm:$0xff]  ;;  %v252_v25 = vadd.f32 %v239_v18, %v216_v22  ;;  %p561_p11 = pnand %p560_p13, %p954_p1  ;;  %s563_s6 = sshll.u32 %s637_s29, 4  ;;  %s564_s6 = int_to_ptr.vmem [resolvable:$false] %s563_s6 }
  0x5b   : > { %278 = vst [vmem:[%s830_s20 + $0x20] sm:$0xff] %v246_v10  ;;  %279 = vst [vmem:[%s830_s20 + $0x28] sm:$0xff] %v247_v14  ;;  %v253_v26 = vadd.f32 %v239_v18, %v217_v23  ;;  %v254_v27 = vadd.f32 %v239_v18, %v218_v24  ;;  %v219_v28 = vld [vmem:[%s807_s24 + $0x68] sm:$0xff]  ;;  %v220_v29 = vld [vmem:[%s807_s24 + $0x70] sm:$0xff]  ;;  %s565_s7 = scalar_lea.vmem %s564_s6, 8192  ;;  %p566_p5 = scmp.lt.s32.totalorder %s890_s17, %s564_s6 }
  0x5c   : > { %280 = vst [vmem:[%s830_s20 + $0x30] sm:$0xff] %v248_v15  ;;  %281 = vst [vmem:[%s830_s20 + $0x38] sm:$0xff] %v249_v16  ;;  %v221_v30 = vld [vmem:[%s807_s24 + $0x78] sm:$0xff]  ;;  %v255_v31 = vadd.f32 %v239_v18, %v219_v28  ;;  %v256_v32 = vadd.f32 %v239_v18, %v220_v29  ;;  %v222_v34 = vld [vmem:[%s807_s24 + $0x80] sm:$0xff]  ;;  %p562_p10 = pneg %p561_p11  ;;  %p567_p7 = scmp.lt.s32.totalorder %s565_s7, %s559_s27 }
  0x5d   : > { %282 = vst [vmem:[%s830_s20 + $0x40] sm:$0xff] %v250_v20  ;;  %283 = vst [vmem:[%s830_s20 + $0x48] sm:$0xff] %v251_v21  ;;  %v257_v33 = vadd.f32 %v239_v18, %v221_v30  ;;  %v240_v35 = vld [vmem:[%s815_s5 + $0x10] sm:$0xff]  ;;  %v223_v36 = vld [vmem:[%s807_s24 + $0x88] sm:$0xff] }
  0x5e   : > { %284 = vst [vmem:[%s830_s20 + $0x50] sm:$0xff] %v252_v25  ;;  %285 = vst [vmem:[%s830_s20 + $0x58] sm:$0xff] %v253_v26  ;;  %v258_v37 = vadd.f32 %v240_v35, %v222_v34  ;;  %v259_v38 = vadd.f32 %v240_v35, %v223_v36  ;;  %v224_v39 = vld [vmem:[%s807_s24 + $0x90] sm:$0xff]  ;;  %v225_v40 = vld [vmem:[%s807_s24 + $0x98] sm:$0xff]  ;;  %p568_p9 = por %p567_p7, %p566_p5 }
  0x5f   : > { %286 = vst [vmem:[%s830_s20 + $0x60] sm:$0xff] %v254_v27  ;;  %v226_v41 = vld [vmem:[%s807_s24 + $0xa0] sm:$0xff]  ;;  %287 = vst [vmem:[%s830_s20 + $0x68] sm:$0xff] %v255_v31  ;;  %v260_v42 = vadd.f32 %v240_v35, %v224_v39  ;;  %v261_v43 = vadd.f32 %v240_v35, %v225_v40  ;;  %v227_v45 = vld [vmem:[%s807_s24 + $0xa8] sm:$0xff] }
  0x60   : > { %288 = vst [vmem:[%s830_s20 + $0x70] sm:$0xff] %v256_v32  ;;  %289 = vst [vmem:[%s830_s20 + $0x78] sm:$0xff] %v257_v33  ;;  %v262_v44 = vadd.f32 %v240_v35, %v226_v41  ;;  %v228_v46 = vld [vmem:[%s807_s24 + $0xb0] sm:$0xff]  ;;  %v229_v47 = vld [vmem:[%s807_s24 + $0xb8] sm:$0xff]  ;;  %v263_v48 = vadd.f32 %v240_v35, %v227_v45  ;;  %p569_p3 = pnand %p568_p9, %p562_p10 }
  0x61   : > { %290 = vst [vmem:[%s830_s20 + $0x80] sm:$0xff] %v258_v37  ;;  %291 = vst [vmem:[%s830_s20 + $0x88] sm:$0xff] %v259_v38  ;;  %v264_v49 = vadd.f32 %v240_v35, %v228_v46  ;;  %v265_v50 = vadd.f32 %v240_v35, %v229_v47  ;;  %v230_v51 = vld [vmem:[%s807_s24 + $0xc0] sm:$0xff]  ;;  %v241_v52 = vld [vmem:[%s815_s5 + $0x18] sm:$0xff] }
  0x62   : > { %v231_v53 = vld [vmem:[%s807_s24 + $0xc8] sm:$0xff]  ;;  %292 = vst [vmem:[%s830_s20 + $0x90] sm:$0xff] %v260_v42  ;;  %293 = vst [vmem:[%s830_s20 + $0x98] sm:$0xff] %v261_v43  ;;  %v266_v54 = vadd.f32 %v241_v52, %v230_v51  ;;  %v232_v56 = vld [vmem:[%s807_s24 + $0xd0] sm:$0xff] }
  0x63   : > { %294 = vst [vmem:[%s830_s20 + $0xa0] sm:$0xff] %v262_v44  ;;  %v267_v55 = vadd.f32 %v241_v52, %v231_v53  ;;  %v233_v57 = vld [vmem:[%s807_s24 + $0xd8] sm:$0xff]  ;;  %v234_v58 = vld [vmem:[%s807_s24 + $0xe0] sm:$0xff]  ;;  %295 = vst [vmem:[%s830_s20 + $0xa8] sm:$0xff] %v263_v48  ;;  %v268_v59 = vadd.f32 %v241_v52, %v232_v56 }
  0x64   : > { %296 = vst [vmem:[%s830_s20 + $0xb0] sm:$0xff] %v264_v49  ;;  %297 = vst [vmem:[%s830_s20 + $0xb8] sm:$0xff] %v265_v50  ;;  %v269_v60 = vadd.f32 %v241_v52, %v233_v57  ;;  %v270_v61 = vadd.f32 %v241_v52, %v234_v58  ;;  %v235_v62 = vld [vmem:[%s807_s24 + $0xe8] sm:$0xff]  ;;  %v236_v63 = vld [vmem:[%s807_s24 + $0xf0] sm:$0xff] }
  0x65   : > { %v237_v0 = vld [vmem:[%s807_s24 + $0xf8] sm:$0xff]  ;;  %298 = vst [vmem:[%s830_s20 + $0xc0] sm:$0xff] %v266_v54  ;;  %299 = vst [vmem:[%s830_s20 + $0xc8] sm:$0xff] %v267_v55  ;;  %v271_v1 = vadd.f32 %v241_v52, %v235_v62  ;;  %v272_v2 = vadd.f32 %v241_v52, %v236_v63 }
  0x66   : > { %v273_v3 = vadd.f32 %v241_v52, %v237_v0  ;;  %300 = vst [vmem:[%s830_s20 + $0xd0] sm:$0xff] %v268_v59  ;;  %301 = vst [vmem:[%s830_s20 + $0xd8] sm:$0xff] %v269_v60 }
  0x67   : > { %302 = vst [vmem:[%s830_s20 + $0xe0] sm:$0xff] %v270_v61  ;;  %303 = vst [vmem:[%s830_s20 + $0xe8] sm:$0xff] %v271_v1 }
  0x68   : > { %304 = vst [vmem:[%s830_s20 + $0xf0] sm:$0xff] %v272_v2  ;;  %305 = vst [vmem:[%s830_s20 + $0xf8] sm:$0xff] %v273_v3 }
  0x69   : > { %572 = shalt.err (!%p569_p3)
}
  0x6a   : > { %s573_s14 = scalar_lea.hbm %s888_s25, 4096  ;;  %s577_s19 = scalar_lea.hbm %s944_s2, 8192 }
  0x6b   : > { %p574_p12 = scmp.ne.s32.totalorder %s888_s25, %s573_s14  ;;  %p578_p2 = scmp.lt.u32.totalorder %s888_s25, %s944_s2 }
  0x6c   : > { %p579_p4 = scmp.lt.u32.totalorder %s577_s19, %s573_s14  ;;  %p581_p13 = scmp.lt.u32.totalorder %s573_s14, %s888_s25 }
  0x6d   : > { %p575_p8 = pnand %p574_p12, %p954_p1 }
  0x6e   : > { %p580_p6 = por %p579_p4, %p578_p2 }
  0x6f   : > { %p576_p0 = pneg %p575_p8 }
  0x70   : > { %p582_p11 = por %p581_p13, %p580_p6 }
  0x72   : > { %p583_p10 = pnand %p582_p11, %p576_p0 }
  0x74   : > { %586 = shalt.err (!%p583_p10)
}
  0x75   : > { %s638_s3 = smov 1024   ;;  %s639_s5 = smov 64  }
  0x76   : > { %446 = dma.vmem_to_hbm [thread:$0]  (%p954_p1), %s890_s17, 4096, %s888_s25, %s307_s26, %s638_s3, %s638_s3, %s639_s5  }
  0x77 PF: > { %s336_s20 = sand.u32 1, %s617_s9   ;;  %p955_p5 = scmp.ne.s32.totalorder %s950_s22, 0 }
  0x78   : > { %p956_p7 = scmp.ge.s32.totalorder %s629_s12, 2  ;;  %s337_s8 = scalar_lea.sflag [#allocation4], %s336_s20 }
  0x7a   : > { %p456_p9 = pnand %p956_p7, %p955_p5 }
  0x7c   : > { %612 = dma.done.wait (!%p456_p9), %s337_s8, 4096  }
  0x7d   : > { %614 = vsyncadd (!%p456_p9), %s337_s8, 4294963200  ;;  %p18_p3 = scmp.ge.s32.totalorder %s680_s15, 4   ;;  %s957_s9 = smov %s621_s10 }
  0x7e   : > { %s958_s10 = smov %s625_s11  ;;  %s959_s11 = smov %s692_s18 }
  0x7f   : > { %s960_s12 = smov %s680_s15  ;;  %20 = sbr.rel (!%p18_p3) target bundleno = 7 (0x7), region = 86 }
  0x86   :  { %342 = vsyncpa [#allocation3], 1 }
  0x87   :  { %344 = vsyncpa [#allocation3 + $0x1], 1 }
  0x88   :  { %345 = vsyncpa [#allocation6], 1 }
  0x89   :  { %347 = vsyncpa [#allocation6 + $0x1], 1 }
  0x8a   :  { %348 = vsyncpa [#allocation4], 1 }
  0x8b   :  { %350 = vsyncpa [#allocation4 + $0x1], 1 }

</bundles_post_ra>
